<compile_context>
chip_gen: v7x
topology: tpu7x:2x2x1
jax: 0.10.0
libtpu: 0.0.40
codegen_flags: <defaults>
</compile_context>

<pallas_src>
import functools

import jax
import jax.numpy as jnp
import numpy as np
from jax.experimental import pallas as pl
from jax.experimental.pallas import tpu as pltpu


def _round_up(x, m):
    return ((x + m - 1) // m) * m


def _choose_tile_s(batch, seq, hp):
    """Rows-per-tile along the sequence axis.

    Big tiles amortise the ~0.35us/grid-step overhead; cap so ~12 live /
    double-buffered (tile_s, Hp) f32 slabs stay well under the scoped VMEM
    limit on every generation (incl. v7x).
    """
    s8 = _round_up(max(seq, 1), 8)
    cap = (16 * 1024 * 1024) // (12 * hp * 4)
    cap = max(8, (min(cap, 1024) // 8) * 8)
    tile = min(s8, cap)
    if batch == 1 and s8 >= 16:
        # Keep at least 2 grid programs so both TensorCores are used on v7x.
        tile = min(tile, _round_up(s8 // 2, 8))
    return max(8, (tile // 8) * 8)


def act_kernel(state_ref, time_ref, pos_ref, w_ref, rows_ref, bp_ref,
               prev_ref, misc_ref, *, max_hop, threshold):
    """ACT loop for one (tile_s, Hp) tile of tokens; hop loop fully unrolled."""
    state = state_ref[...]                     # (T, Hp) f32
    time_enc = time_ref[...]                   # (T, Hp) f32 (shared over batch)
    w = w_ref[...]                             # (Hp, Hp) f32, zero-padded Wfn
    wp_row = rows_ref[0:1, :]                  # (1, Hp)  halting weights
    bfn_row = rows_ref[1:2, :]                 # (1, Hp)  fn bias
    bp = bp_ref[0]                             # scalar   halting bias (SMEM)

    t = state.shape[0]
    zeros_col = jnp.zeros((t, 1), jnp.float32)
    halting = zeros_col
    remainders = zeros_col
    n_updates = zeros_col
    prev = jnp.zeros_like(state)

    # max_hop is a small static int -> full unroll (static pos slices, full
    # scheduler visibility).  After a token halts every later iteration is an
    # exact no-op for all outputs, so this fixed-count loop reproduces the
    # data-dependent while loop of the reference.
    for step in range(max_hop):
        state = state + time_enc + pos_ref[step:step + 1, :]

        # Halting logit stays exactly f32 on the VPU (mul) + XLU (lane
        # reduce); no extra MXU lane block is spent on it.
        logit = jnp.sum(state * wp_row, axis=-1, keepdims=True) + bp
        p = jax.nn.sigmoid(logit)                              # (T, 1)

        # fn(state): one (T,Hp) @ (Hp,Hp) MXU pass, bias on live lanes only.
        # TODO(synk): optionally cast state/w to bf16 here on v6e/v7x (keep
        # f32 accumulation and the f32 logit path above) when downstream
        # consumers tolerate it.
        new_state = jnp.dot(state, w, preferred_element_type=jnp.float32) + bfn_row

        running = halting < 1.0                                # bool (T, 1)
        cand = halting + p
        would_halt = cand > threshold
        new_halted = jnp.logical_and(running, would_halt)
        still = jnp.logical_and(running, jnp.logical_not(would_halt))

        halting = jnp.where(still, cand, halting)
        remainders = jnp.where(new_halted, remainders + (1.0 - halting),
                               remainders)
        # Reference does halting += new_halted * remainders (== 1.0 up to
        # 1 ulp); clamping to exactly 1.0 guarantees later iterations are
        # strict no-ops for halted tokens (intentional, documented divergence
        # that does not affect the returned outputs).
        halting = jnp.where(new_halted, 1.0, halting)
        n_updates = n_updates + running.astype(jnp.float32)    # == still + new_halted
        update_w = jnp.where(new_halted, remainders,
                             jnp.where(still, p, 0.0))

        state = new_state
        prev = prev + update_w * (state - prev)

    prev_ref[...] = prev
    # Lane-dense combined output: lane 0 = remainders, lane 1 = n_updates.
    lane = jax.lax.broadcasted_iota(jnp.int32, (t, 128), 1)
    misc_ref[...] = jnp.where(lane == 0, remainders,
                              jnp.where(lane == 1, n_updates, 0.0))


def act_basic_forward(state, inputs, time_enc, pos_enc,
                      wp, bp, wfn, bfn, max_hop, threshold=0.9):
    """JAX wrapper matching ACT_basic.forward (decoding=False path)."""
    B, S, H = inputs.shape
    Hp = _round_up(H, 128)
    tile_s = _choose_tile_s(B, S, Hp)
    Sp = _round_up(S, tile_s)
    pos_rows = _round_up(int(max_hop), 8)

    f32 = jnp.float32
    state3 = jnp.pad(state.astype(f32), ((0, 0), (0, Sp - S), (0, Hp - H)))
    time3 = jnp.pad(time_enc[:, :S, :].astype(f32),
                    ((0, 0), (0, Sp - S), (0, Hp - H)))
    pos2 = jnp.pad(pos_enc[0, :max_hop, :].astype(f32),
                   ((0, pos_rows - int(max_hop)), (0, Hp - H)))
    w2 = jnp.pad(wfn.astype(f32), ((0, Hp - H), (0, Hp - H)))

    rows = jnp.zeros((8, Hp), f32)                       # row 0: wp, row 1: bfn
    rows = rows.at[0, :H].set(wp[:, 0].astype(f32))
    rows = rows.at[1, :H].set(bfn.reshape(-1).astype(f32))
    bp_arr = jnp.asarray(bp, f32).reshape(-1)[:1]        # (1,) scalar in SMEM

    kernel = functools.partial(act_kernel, max_hop=int(max_hop),
                               threshold=float(threshold))

    grid = (B, Sp // tile_s)

    prev3, misc3 = pl.pallas_call(
        kernel,
        grid=grid,
        in_specs=[
            pl.BlockSpec((None, tile_s, Hp), lambda b, s: (b, s, 0)),   # state
            pl.BlockSpec((None, tile_s, Hp), lambda b, s: (0, s, 0)),   # time (shared over batch)
            pl.BlockSpec((pos_rows, Hp), lambda b, s: (0, 0)),          # pos   (resident)
            pl.BlockSpec((Hp, Hp), lambda b, s: (0, 0)),                # Wfn   (resident)
            pl.BlockSpec((8, Hp), lambda b, s: (0, 0)),                 # wp/bfn rows (resident)
            pl.BlockSpec(memory_space=pltpu.MemorySpace.SMEM),          # bp scalar
        ],
        out_specs=(
            pl.BlockSpec((None, tile_s, Hp), lambda b, s: (b, s, 0)),   # previous_state
            pl.BlockSpec((None, tile_s, 128), lambda b, s: (b, s, 0)),  # rem/nup (lane-dense)
        ),
        out_shape=(
            jax.ShapeDtypeStruct((B, Sp, Hp), f32),
            jax.ShapeDtypeStruct((B, Sp, 128), f32),
        ),
        compiler_params=pltpu.CompilerParams(
            dimension_semantics=("parallel", "parallel"),
            vmem_limit_bytes=32 * 1024 * 1024),
    )(state3, time3, pos2, w2, rows, bp_arr)

    previous_state = prev3[:, :S, :H]
    remainders = misc3[:, :S, 0]
    n_updates = misc3[:, :S, 1]
    return previous_state, (remainders, n_updates)


def reference_numpy(state, inputs, time_enc, pos_enc, wp, bp, wfn, bfn,
                    max_hop, threshold=0.9):
    """Literal NumPy transcription of the PyTorch while-loop (decoding=False)."""
    state = np.asarray(state, np.float32).copy()
    time_enc = np.asarray(time_enc, np.float32)
    pos_enc = np.asarray(pos_enc, np.float32)
    wp = np.asarray(wp, np.float32)
    bp = float(np.asarray(bp).reshape(-1)[0])
    wfn = np.asarray(wfn, np.float32)
    bfn = np.asarray(bfn, np.float32)

    B, S, H = inputs.shape
    halting = np.zeros((B, S), np.float32)
    remainders = np.zeros((B, S), np.float32)
    n_updates = np.zeros((B, S), np.float32)
    prev = np.zeros_like(state)
    step = 0
    while ((halting < threshold) & (n_updates < max_hop)).any():
        state = state + time_enc[:, :S, :]
        state = state + pos_enc[:, step, :][:, None, :]
        p = 1.0 / (1.0 + np.exp(-(state @ wp[:, 0] + bp)))      # (B, S)
        still = (halting < 1.0).astype(np.float32)
        new_halted = ((halting + p * still) > threshold).astype(np.float32) * still
        still = ((halting + p * still) <= threshold).astype(np.float32) * still
        halting = halting + p * still
        remainders = remainders + new_halted * (1.0 - halting)
        halting = halting + new_halted * remainders
        n_updates = n_updates + still + new_halted
        uw = p * still + new_halted * remainders
        state = state @ wfn + bfn                                # fn(state)
        prev = state * uw[..., None] + prev * (1.0 - uw[..., None])
        step += 1
    return prev, remainders, n_updates


if __name__ == "__main__":
    B, S, H = 2, 8, 32
    MAX_HOP = 4

    key = jax.random.PRNGKey(0)
    ks = jax.random.split(key, 7)

    state = jax.random.normal(ks[0], (B, S, H), jnp.float32) * 0.1
    inputs = jax.random.normal(ks[1], (B, S, H), jnp.float32) * 0.1
    time_enc = jax.random.normal(ks[2], (1, S, H), jnp.float32) * 0.1
    pos_enc = jax.random.normal(ks[3], (1, MAX_HOP, H), jnp.float32) * 0.1

    # ACT halting linear (nn.Linear(hidden_size, 1), bias filled with 1.0).
    wp = jax.random.normal(ks[4], (H, 1), jnp.float32) * 0.01
    bp = jnp.ones((1, 1), jnp.float32)
    # Transition fn parameters (deterministic synthetic linear layer).
    wfn = jax.random.normal(ks[5], (H, H), jnp.float32) * (0.5 / np.sqrt(H))
    bfn = jax.random.normal(ks[6], (1, H), jnp.float32) * 0.01

    prev_state, (remainders, n_updates) = act_basic_forward(
        state, inputs, time_enc, pos_enc, wp, bp, wfn, bfn,
        max_hop=MAX_HOP, threshold=0.9)
    jax.block_until_ready(prev_state)

    ref_prev, ref_rem, ref_nup = reference_numpy(
        state, inputs, time_enc, pos_enc, wp, bp, wfn, bfn,
        max_hop=MAX_HOP, threshold=0.9)

    assert np.allclose(np.asarray(prev_state), ref_prev, rtol=1e-4, atol=1e-4)
    assert np.allclose(np.asarray(remainders), ref_rem, rtol=1e-4, atol=1e-4)
    assert np.allclose(np.asarray(n_updates), ref_nup, rtol=1e-4, atol=1e-4)

    print("KERNEL_OK")
</pallas_src>

<mosaic_0001>
module attributes {stable_mosaic.version = 11 : i64} {
  func.func @act_kernel(%arg0: i32, %arg1: i32, %arg2: memref<1x8x128xf32, #tpu.memory_space<vmem>>, %arg3: memref<1x8x128xf32, #tpu.memory_space<vmem>>, %arg4: memref<8x128xf32, #tpu.memory_space<vmem>>, %arg5: memref<128x128xf32, #tpu.memory_space<vmem>>, %arg6: memref<8x128xf32, #tpu.memory_space<vmem>>, %arg7: memref<1xf32, #tpu.memory_space<smem>>, %arg8: memref<1x8x128xf32, #tpu.memory_space<vmem>>, %arg9: memref<1x8x128xf32, #tpu.memory_space<vmem>>) attributes {dimension_semantics = [#tpu.dimension_semantics<parallel>, #tpu.dimension_semantics<parallel>], iteration_bounds = array<i64: 2, 1>, scalar_prefetch = 0 : i64, scratch_operands = 0 : i64, tpu.core_type = #tpu.core_type<tc>, window_params = [{transform_indices = @transform_0, window_bounds = array<i64: 1, 8, 128>}, {transform_indices = @transform_1, window_bounds = array<i64: 1, 8, 128>}, {pipeline_mode = #tpu.pipeline_mode<synchronous>, transform_indices = @transform_2, window_bounds = array<i64: 8, 128>}, {pipeline_mode = #tpu.pipeline_mode<synchronous>, transform_indices = @transform_3, window_bounds = array<i64: 128, 128>}, {pipeline_mode = #tpu.pipeline_mode<synchronous>, transform_indices = @transform_4, window_bounds = array<i64: 8, 128>}, {transform_indices = @transform_5, window_bounds = array<i64: 1>}, {transform_indices = @transform_6, window_bounds = array<i64: 1, 8, 128>}, {transform_indices = @transform_7, window_bounds = array<i64: 1, 8, 128>}]} {
    %c0 = arith.constant 0 : index
    %c0_0 = arith.constant 0 : index
    %c0_1 = arith.constant 0 : index
    %0 = vector.load %arg2[%c0, %c0_0, %c0_1] : memref<1x8x128xf32, #tpu.memory_space<vmem>>, vector<1x8x128xf32>
    %1 = vector.shape_cast %0 : vector<1x8x128xf32> to vector<8x128xf32>
    %c0_2 = arith.constant 0 : index
    %c0_3 = arith.constant 0 : index
    %c0_4 = arith.constant 0 : index
    %2 = vector.load %arg3[%c0_2, %c0_3, %c0_4] : memref<1x8x128xf32, #tpu.memory_space<vmem>>, vector<1x8x128xf32>
    %3 = vector.shape_cast %2 : vector<1x8x128xf32> to vector<8x128xf32>
    %c0_5 = arith.constant 0 : index
    %c0_6 = arith.constant 0 : index
    %4 = vector.load %arg5[%c0_5, %c0_6] : memref<128x128xf32, #tpu.memory_space<vmem>>, vector<128x128xf32>
    %c0_7 = arith.constant 0 : index
    %c0_8 = arith.constant 0 : index
    %5 = vector.load %arg6[%c0_7, %c0_8] : memref<8x128xf32, #tpu.memory_space<vmem>>, vector<1x128xf32>
    %c1 = arith.constant 1 : index
    %c0_9 = arith.constant 0 : index
    %6 = vector.load %arg6[%c1, %c0_9] : memref<8x128xf32, #tpu.memory_space<vmem>>, vector<1x128xf32>
    %c0_10 = arith.constant 0 : index
    %7 = memref.load %arg7[%c0_10] : memref<1xf32, #tpu.memory_space<smem>>
    %cst = arith.constant 0.000000e+00 : f32
    %8 = vector.broadcast %cst : f32 to vector<8x1xf32>
    %cst_11 = arith.constant 0.000000e+00 : f32
    %9 = vector.broadcast %cst_11 : f32 to vector<8x128xf32>
    %10 = arith.addf %1, %3 : vector<8x128xf32>
    %c0_12 = arith.constant 0 : index
    %c0_13 = arith.constant 0 : index
    %11 = vector.load %arg4[%c0_12, %c0_13] : memref<8x128xf32, #tpu.memory_space<vmem>>, vector<1x128xf32>
    %12 = vector.broadcast %11 : vector<1x128xf32> to vector<8x128xf32>
    %13 = arith.addf %10, %12 : vector<8x128xf32>
    %14 = vector.broadcast %5 : vector<1x128xf32> to vector<8x128xf32>
    %15 = arith.mulf %13, %14 : vector<8x128xf32>
    %cst_14 = arith.constant dense<0.000000e+00> : vector<8xf32>
    %16 = vector.multi_reduction <add>, %15, %cst_14 [1] : vector<8x128xf32> to vector<8xf32>
    %17 = vector.shape_cast %16 : vector<8xf32> to vector<8x1xf32>
    %18 = vector.broadcast %7 : f32 to vector<8x1xf32>
    %19 = arith.addf %17, %18 : vector<8x1xf32>
    %20 = arith.negf %19 : vector<8x1xf32>
    %21 = math.exp %20 : vector<8x1xf32>
    %cst_15 = arith.constant 1.000000e+00 : f32
    %22 = vector.broadcast %cst_15 : f32 to vector<8x1xf32>
    %23 = arith.addf %22, %21 : vector<8x1xf32>
    %24 = arith.divf %22, %23 : vector<8x1xf32>
    %cst_16 = arith.constant dense<0.000000e+00> : vector<8x128xf32>
    %25 = tpu.matmul %13, %4, %cst_16 {dimension_numbers = #tpu.dot_dimension_numbers<[1], [0], [0], [1], [0, 0, 1, 1], [], []>} : vector<8x128xf32>, vector<128x128xf32>, vector<8x128xf32> -> vector<8x128xf32>
    %26 = vector.broadcast %6 : vector<1x128xf32> to vector<8x128xf32>
    %27 = arith.addf %25, %26 : vector<8x128xf32>
    %cst_17 = arith.constant 1.000000e+00 : f32
    %28 = vector.broadcast %cst_17 : f32 to vector<8x1xf32>
    %29 = arith.cmpf olt, %8, %28 : vector<8x1xf32>
    %30 = arith.addf %8, %24 : vector<8x1xf32>
    %cst_18 = arith.constant 0.899999976 : f32
    %31 = vector.broadcast %cst_18 : f32 to vector<8x1xf32>
    %32 = arith.cmpf ogt, %30, %31 : vector<8x1xf32>
    %33 = arith.andi %29, %32 : vector<8x1xi1>
    %cst_19 = arith.constant dense<true> : vector<8x1xi1>
    %34 = arith.xori %32, %cst_19 : vector<8x1xi1>
    %35 = arith.andi %29, %34 : vector<8x1xi1>
    %36 = arith.select %35, %30, %8 : vector<8x1xi1>, vector<8x1xf32>
    %cst_20 = arith.constant 1.000000e+00 : f32
    %37 = vector.broadcast %cst_20 : f32 to vector<8x1xf32>
    %38 = arith.subf %37, %36 : vector<8x1xf32>
    %39 = arith.addf %8, %38 : vector<8x1xf32>
    %40 = arith.select %33, %39, %8 : vector<8x1xi1>, vector<8x1xf32>
    %cst_21 = arith.constant 1.000000e+00 : f32
    %41 = vector.broadcast %cst_21 : f32 to vector<8x1xf32>
    %42 = arith.select %33, %41, %36 : vector<8x1xi1>, vector<8x1xf32>
    %43 = arith.extui %29 : vector<8x1xi1> to vector<8x1xi32>
    %44 = arith.sitofp %43 : vector<8x1xi32> to vector<8x1xf32>
    %45 = arith.addf %8, %44 : vector<8x1xf32>
    %cst_22 = arith.constant 0.000000e+00 : f32
    %46 = vector.broadcast %cst_22 : f32 to vector<8x1xf32>
    %47 = arith.select %35, %24, %46 : vector<8x1xi1>, vector<8x1xf32>
    %48 = arith.select %33, %40, %47 : vector<8x1xi1>, vector<8x1xf32>
    %49 = arith.subf %27, %9 : vector<8x128xf32>
    %50 = vector.broadcast %48 : vector<8x1xf32> to vector<8x128xf32>
    %51 = arith.mulf %50, %49 : vector<8x128xf32>
    %52 = arith.addf %9, %51 : vector<8x128xf32>
    %53 = arith.addf %27, %3 : vector<8x128xf32>
    %c1_23 = arith.constant 1 : index
    %c0_24 = arith.constant 0 : index
    %54 = vector.load %arg4[%c1_23, %c0_24] : memref<8x128xf32, #tpu.memory_space<vmem>>, vector<1x128xf32>
    %55 = vector.broadcast %54 : vector<1x128xf32> to vector<8x128xf32>
    %56 = arith.addf %53, %55 : vector<8x128xf32>
    %57 = vector.broadcast %5 : vector<1x128xf32> to vector<8x128xf32>
    %58 = arith.mulf %56, %57 : vector<8x128xf32>
    %cst_25 = arith.constant dense<0.000000e+00> : vector<8xf32>
    %59 = vector.multi_reduction <add>, %58, %cst_25 [1] : vector<8x128xf32> to vector<8xf32>
    %60 = vector.shape_cast %59 : vector<8xf32> to vector<8x1xf32>
    %61 = vector.broadcast %7 : f32 to vector<8x1xf32>
    %62 = arith.addf %60, %61 : vector<8x1xf32>
    %63 = arith.negf %62 : vector<8x1xf32>
    %64 = math.exp %63 : vector<8x1xf32>
    %cst_26 = arith.constant 1.000000e+00 : f32
    %65 = vector.broadcast %cst_26 : f32 to vector<8x1xf32>
    %66 = arith.addf %65, %64 : vector<8x1xf32>
    %67 = arith.divf %65, %66 : vector<8x1xf32>
    %cst_27 = arith.constant dense<0.000000e+00> : vector<8x128xf32>
    %68 = tpu.matmul %56, %4, %cst_27 {dimension_numbers = #tpu.dot_dimension_numbers<[1], [0], [0], [1], [0, 0, 1, 1], [], []>} : vector<8x128xf32>, vector<128x128xf32>, vector<8x128xf32> -> vector<8x128xf32>
    %69 = vector.broadcast %6 : vector<1x128xf32> to vector<8x128xf32>
    %70 = arith.addf %68, %69 : vector<8x128xf32>
    %cst_28 = arith.constant 1.000000e+00 : f32
    %71 = vector.broadcast %cst_28 : f32 to vector<8x1xf32>
    %72 = arith.cmpf olt, %42, %71 : vector<8x1xf32>
    %73 = arith.addf %42, %67 : vector<8x1xf32>
    %cst_29 = arith.constant 0.899999976 : f32
    %74 = vector.broadcast %cst_29 : f32 to vector<8x1xf32>
    %75 = arith.cmpf ogt, %73, %74 : vector<8x1xf32>
    %76 = arith.andi %72, %75 : vector<8x1xi1>
    %cst_30 = arith.constant dense<true> : vector<8x1xi1>
    %77 = arith.xori %75, %cst_30 : vector<8x1xi1>
    %78 = arith.andi %72, %77 : vector<8x1xi1>
    %79 = arith.select %78, %73, %42 : vector<8x1xi1>, vector<8x1xf32>
    %cst_31 = arith.constant 1.000000e+00 : f32
    %80 = vector.broadcast %cst_31 : f32 to vector<8x1xf32>
    %81 = arith.subf %80, %79 : vector<8x1xf32>
    %82 = arith.addf %40, %81 : vector<8x1xf32>
    %83 = arith.select %76, %82, %40 : vector<8x1xi1>, vector<8x1xf32>
    %cst_32 = arith.constant 1.000000e+00 : f32
    %84 = vector.broadcast %cst_32 : f32 to vector<8x1xf32>
    %85 = arith.select %76, %84, %79 : vector<8x1xi1>, vector<8x1xf32>
    %86 = arith.extui %72 : vector<8x1xi1> to vector<8x1xi32>
    %87 = arith.sitofp %86 : vector<8x1xi32> to vector<8x1xf32>
    %88 = arith.addf %45, %87 : vector<8x1xf32>
    %cst_33 = arith.constant 0.000000e+00 : f32
    %89 = vector.broadcast %cst_33 : f32 to vector<8x1xf32>
    %90 = arith.select %78, %67, %89 : vector<8x1xi1>, vector<8x1xf32>
    %91 = arith.select %76, %83, %90 : vector<8x1xi1>, vector<8x1xf32>
    %92 = arith.subf %70, %52 : vector<8x128xf32>
    %93 = vector.broadcast %91 : vector<8x1xf32> to vector<8x128xf32>
    %94 = arith.mulf %93, %92 : vector<8x128xf32>
    %95 = arith.addf %52, %94 : vector<8x128xf32>
    %96 = arith.addf %70, %3 : vector<8x128xf32>
    %c2 = arith.constant 2 : index
    %c0_34 = arith.constant 0 : index
    %97 = vector.load %arg4[%c2, %c0_34] : memref<8x128xf32, #tpu.memory_space<vmem>>, vector<1x128xf32>
    %98 = vector.broadcast %97 : vector<1x128xf32> to vector<8x128xf32>
    %99 = arith.addf %96, %98 : vector<8x128xf32>
    %100 = vector.broadcast %5 : vector<1x128xf32> to vector<8x128xf32>
    %101 = arith.mulf %99, %100 : vector<8x128xf32>
    %cst_35 = arith.constant dense<0.000000e+00> : vector<8xf32>
    %102 = vector.multi_reduction <add>, %101, %cst_35 [1] : vector<8x128xf32> to vector<8xf32>
    %103 = vector.shape_cast %102 : vector<8xf32> to vector<8x1xf32>
    %104 = vector.broadcast %7 : f32 to vector<8x1xf32>
    %105 = arith.addf %103, %104 : vector<8x1xf32>
    %106 = arith.negf %105 : vector<8x1xf32>
    %107 = math.exp %106 : vector<8x1xf32>
    %cst_36 = arith.constant 1.000000e+00 : f32
    %108 = vector.broadcast %cst_36 : f32 to vector<8x1xf32>
    %109 = arith.addf %108, %107 : vector<8x1xf32>
    %110 = arith.divf %108, %109 : vector<8x1xf32>
    %cst_37 = arith.constant dense<0.000000e+00> : vector<8x128xf32>
    %111 = tpu.matmul %99, %4, %cst_37 {dimension_numbers = #tpu.dot_dimension_numbers<[1], [0], [0], [1], [0, 0, 1, 1], [], []>} : vector<8x128xf32>, vector<128x128xf32>, vector<8x128xf32> -> vector<8x128xf32>
    %112 = vector.broadcast %6 : vector<1x128xf32> to vector<8x128xf32>
    %113 = arith.addf %111, %112 : vector<8x128xf32>
    %cst_38 = arith.constant 1.000000e+00 : f32
    %114 = vector.broadcast %cst_38 : f32 to vector<8x1xf32>
    %115 = arith.cmpf olt, %85, %114 : vector<8x1xf32>
    %116 = arith.addf %85, %110 : vector<8x1xf32>
    %cst_39 = arith.constant 0.899999976 : f32
    %117 = vector.broadcast %cst_39 : f32 to vector<8x1xf32>
    %118 = arith.cmpf ogt, %116, %117 : vector<8x1xf32>
    %119 = arith.andi %115, %118 : vector<8x1xi1>
    %cst_40 = arith.constant dense<true> : vector<8x1xi1>
    %120 = arith.xori %118, %cst_40 : vector<8x1xi1>
    %121 = arith.andi %115, %120 : vector<8x1xi1>
    %122 = arith.select %121, %116, %85 : vector<8x1xi1>, vector<8x1xf32>
    %cst_41 = arith.constant 1.000000e+00 : f32
    %123 = vector.broadcast %cst_41 : f32 to vector<8x1xf32>
    %124 = arith.subf %123, %122 : vector<8x1xf32>
    %125 = arith.addf %83, %124 : vector<8x1xf32>
    %126 = arith.select %119, %125, %83 : vector<8x1xi1>, vector<8x1xf32>
    %cst_42 = arith.constant 1.000000e+00 : f32
    %127 = vector.broadcast %cst_42 : f32 to vector<8x1xf32>
    %128 = arith.select %119, %127, %122 : vector<8x1xi1>, vector<8x1xf32>
    %129 = arith.extui %115 : vector<8x1xi1> to vector<8x1xi32>
    %130 = arith.sitofp %129 : vector<8x1xi32> to vector<8x1xf32>
    %131 = arith.addf %88, %130 : vector<8x1xf32>
    %cst_43 = arith.constant 0.000000e+00 : f32
    %132 = vector.broadcast %cst_43 : f32 to vector<8x1xf32>
    %133 = arith.select %121, %110, %132 : vector<8x1xi1>, vector<8x1xf32>
    %134 = arith.select %119, %126, %133 : vector<8x1xi1>, vector<8x1xf32>
    %135 = arith.subf %113, %95 : vector<8x128xf32>
    %136 = vector.broadcast %134 : vector<8x1xf32> to vector<8x128xf32>
    %137 = arith.mulf %136, %135 : vector<8x128xf32>
    %138 = arith.addf %95, %137 : vector<8x128xf32>
    %139 = arith.addf %113, %3 : vector<8x128xf32>
    %c3 = arith.constant 3 : index
    %c0_44 = arith.constant 0 : index
    %140 = vector.load %arg4[%c3, %c0_44] : memref<8x128xf32, #tpu.memory_space<vmem>>, vector<1x128xf32>
    %141 = vector.broadcast %140 : vector<1x128xf32> to vector<8x128xf32>
    %142 = arith.addf %139, %141 : vector<8x128xf32>
    %143 = vector.broadcast %5 : vector<1x128xf32> to vector<8x128xf32>
    %144 = arith.mulf %142, %143 : vector<8x128xf32>
    %cst_45 = arith.constant dense<0.000000e+00> : vector<8xf32>
    %145 = vector.multi_reduction <add>, %144, %cst_45 [1] : vector<8x128xf32> to vector<8xf32>
    %146 = vector.shape_cast %145 : vector<8xf32> to vector<8x1xf32>
    %147 = vector.broadcast %7 : f32 to vector<8x1xf32>
    %148 = arith.addf %146, %147 : vector<8x1xf32>
    %149 = arith.negf %148 : vector<8x1xf32>
    %150 = math.exp %149 : vector<8x1xf32>
    %cst_46 = arith.constant 1.000000e+00 : f32
    %151 = vector.broadcast %cst_46 : f32 to vector<8x1xf32>
    %152 = arith.addf %151, %150 : vector<8x1xf32>
    %153 = arith.divf %151, %152 : vector<8x1xf32>
    %cst_47 = arith.constant dense<0.000000e+00> : vector<8x128xf32>
    %154 = tpu.matmul %142, %4, %cst_47 {dimension_numbers = #tpu.dot_dimension_numbers<[1], [0], [0], [1], [0, 0, 1, 1], [], []>} : vector<8x128xf32>, vector<128x128xf32>, vector<8x128xf32> -> vector<8x128xf32>
    %155 = vector.broadcast %6 : vector<1x128xf32> to vector<8x128xf32>
    %156 = arith.addf %154, %155 : vector<8x128xf32>
    %cst_48 = arith.constant 1.000000e+00 : f32
    %157 = vector.broadcast %cst_48 : f32 to vector<8x1xf32>
    %158 = arith.cmpf olt, %128, %157 : vector<8x1xf32>
    %159 = arith.addf %128, %153 : vector<8x1xf32>
    %cst_49 = arith.constant 0.899999976 : f32
    %160 = vector.broadcast %cst_49 : f32 to vector<8x1xf32>
    %161 = arith.cmpf ogt, %159, %160 : vector<8x1xf32>
    %162 = arith.andi %158, %161 : vector<8x1xi1>
    %cst_50 = arith.constant dense<true> : vector<8x1xi1>
    %163 = arith.xori %161, %cst_50 : vector<8x1xi1>
    %164 = arith.andi %158, %163 : vector<8x1xi1>
    %165 = arith.select %164, %159, %128 : vector<8x1xi1>, vector<8x1xf32>
    %cst_51 = arith.constant 1.000000e+00 : f32
    %166 = vector.broadcast %cst_51 : f32 to vector<8x1xf32>
    %167 = arith.subf %166, %165 : vector<8x1xf32>
    %168 = arith.addf %126, %167 : vector<8x1xf32>
    %169 = arith.select %162, %168, %126 : vector<8x1xi1>, vector<8x1xf32>
    %170 = arith.extui %158 : vector<8x1xi1> to vector<8x1xi32>
    %171 = arith.sitofp %170 : vector<8x1xi32> to vector<8x1xf32>
    %172 = arith.addf %131, %171 : vector<8x1xf32>
    %cst_52 = arith.constant 0.000000e+00 : f32
    %173 = vector.broadcast %cst_52 : f32 to vector<8x1xf32>
    %174 = arith.select %164, %153, %173 : vector<8x1xi1>, vector<8x1xf32>
    %175 = arith.select %162, %169, %174 : vector<8x1xi1>, vector<8x1xf32>
    %176 = arith.subf %156, %138 : vector<8x128xf32>
    %177 = vector.broadcast %175 : vector<8x1xf32> to vector<8x128xf32>
    %178 = arith.mulf %177, %176 : vector<8x128xf32>
    %179 = arith.addf %138, %178 : vector<8x128xf32>
    %c0_53 = arith.constant 0 : index
    %c0_54 = arith.constant 0 : index
    %c0_55 = arith.constant 0 : index
    %180 = vector.load %arg8[%c0_53, %c0_54, %c0_55] : memref<1x8x128xf32, #tpu.memory_space<vmem>>, vector<1x8x128xf32>
    %181 = vector.shape_cast %180 : vector<1x8x128xf32> to vector<8x128xf32>
    %182 = vector.shape_cast %179 : vector<8x128xf32> to vector<1x8x128xf32>
    tpu.vector_store %arg8[%c0_53, %c0_54, %c0_55], %182 {strides = array<i32>} : memref<1x8x128xf32, #tpu.memory_space<vmem>>, vector<1x8x128xf32>,
    %183 = tpu.iota {dimensions = array<i32: 1>} : vector<8x128xi32>
    %c0_i32 = arith.constant 0 : i32
    %184 = vector.broadcast %c0_i32 : i32 to vector<8x128xi32>
    %185 = arith.cmpi eq, %183, %184 : vector<8x128xi32>
    %c1_i32 = arith.constant 1 : i32
    %186 = vector.broadcast %c1_i32 : i32 to vector<8x128xi32>
    %187 = arith.cmpi eq, %183, %186 : vector<8x128xi32>
    %cst_56 = arith.constant 0.000000e+00 : f32
    %188 = vector.shape_cast %172 : vector<8x1xf32> to vector<8x1xf32>
    %189 = vector.broadcast %188 : vector<8x1xf32> to vector<8x128xf32>
    %190 = vector.broadcast %cst_56 : f32 to vector<8x128xf32>
    %191 = arith.select %187, %189, %190 : vector<8x128xi1>, vector<8x128xf32>
    %192 = vector.shape_cast %169 : vector<8x1xf32> to vector<8x1xf32>
    %193 = vector.broadcast %192 : vector<8x1xf32> to vector<8x128xf32>
    %194 = arith.select %185, %193, %191 : vector<8x128xi1>, vector<8x128xf32>
    %c0_57 = arith.constant 0 : index
    %c0_58 = arith.constant 0 : index
    %c0_59 = arith.constant 0 : index
    %195 = vector.load %arg9[%c0_57, %c0_58, %c0_59] : memref<1x8x128xf32, #tpu.memory_space<vmem>>, vector<1x8x128xf32>
    %196 = vector.shape_cast %195 : vector<1x8x128xf32> to vector<8x128xf32>
    %197 = vector.shape_cast %194 : vector<8x128xf32> to vector<1x8x128xf32>
    tpu.vector_store %arg9[%c0_57, %c0_58, %c0_59], %197 {strides = array<i32>} : memref<1x8x128xf32, #tpu.memory_space<vmem>>, vector<1x8x128xf32>,
    return
  }
  func.func @transform_0(%arg0: i32, %arg1: i32) -> (i32, i32, i32) {
    %c0_i32 = arith.constant 0 : i32
    %c0_i32_0 = arith.constant 0 : i32
    return %arg0, %arg1, %c0_i32 : i32, i32, i32
  }
  func.func @transform_1(%arg0: i32, %arg1: i32) -> (i32, i32, i32) {
    %c0_i32 = arith.constant 0 : i32
    %c0_i32_0 = arith.constant 0 : i32
    %c0_i32_1 = arith.constant 0 : i32
    return %c0_i32, %arg1, %c0_i32_0 : i32, i32, i32
  }
  func.func @transform_2(%arg0: i32, %arg1: i32) -> (i32, i32) {
    %c0_i32 = arith.constant 0 : i32
    %c0_i32_0 = arith.constant 0 : i32
    %c0_i32_1 = arith.constant 0 : i32
    return %c0_i32, %c0_i32_0 : i32, i32
  }
  func.func @transform_3(%arg0: i32, %arg1: i32) -> (i32, i32) {
    %c0_i32 = arith.constant 0 : i32
    %c0_i32_0 = arith.constant 0 : i32
    %c0_i32_1 = arith.constant 0 : i32
    return %c0_i32, %c0_i32_0 : i32, i32
  }
  func.func @transform_4(%arg0: i32, %arg1: i32) -> (i32, i32) {
    %c0_i32 = arith.constant 0 : i32
    %c0_i32_0 = arith.constant 0 : i32
    %c0_i32_1 = arith.constant 0 : i32
    return %c0_i32, %c0_i32_0 : i32, i32
  }
  func.func @transform_5(%arg0: i32, %arg1: i32) -> i32 {
    %c0_i32 = arith.constant 0 : i32
    %c0_i32_0 = arith.constant 0 : i32
    return %c0_i32 : i32
  }
  func.func @transform_6(%arg0: i32, %arg1: i32) -> (i32, i32, i32) {
    %c0_i32 = arith.constant 0 : i32
    %c0_i32_0 = arith.constant 0 : i32
    return %arg0, %arg1, %c0_i32 : i32, i32, i32
  }
  func.func @transform_7(%arg0: i32, %arg1: i32) -> (i32, i32, i32) {
    %c0_i32 = arith.constant 0 : i32
    %c0_i32_0 = arith.constant 0 : i32
    return %arg0, %arg1, %c0_i32 : i32, i32, i32
  }
}

</mosaic_0001>

<bundles_post_ra>
// kernel: tpu_custom_call.1
= control target key start
LH: loop header
LB: loop body
LE: loop exit
PB: predicated region body
PF: predicated region fallthrough
CT: control target
= control target key end

     0   :  { %s2167_s0 = inlined_call_operand.hbm [shape: f32[2,8,128], index: 0, kind: input, shape index: {}]   ;;  %s2168_s1 = inlined_call_operand.hbm [shape: f32[1,8,128], index: 1, kind: input, shape index: {}]   ;;  %s2169_s2 = inlined_call_operand.vmem [shape: f32[8,128], index: 2, kind: input, shape index: {}]   ;;  %s2170_s3 = inlined_call_operand.hbm [shape: f32[128,128], index: 3, kind: input, shape index: {}]   ;;  %s2171_s4 = inlined_call_operand.vmem [shape: f32[8,128], index: 4, kind: input, shape index: {}]   ;;  %s2172_s5 = inlined_call_operand.<no memory space> [shape: f32[1], index: 5, kind: input, shape index: {}]   ;;  %s2173_s6 = inlined_call_operand.hbm [shape: f32[2,8,128], index: 6, kind: output, shape index: {0}]   ;;  %s2174_s7 = inlined_call_operand.hbm [shape: f32[2,8,128], index: 7, kind: output, shape index: {1}]  }
   0x1   :  { %13 = sst [smem:[#allocation2]] %s2172_s5 }
   0x2   :  { %14 = vsyncpa [#allocation4], 0 }
   0x3   :  { %16 = vsyncpa [#allocation4 + $0x1], 0 }
   0x4   :  { %17 = vsyncpa [#allocation7], 0 }
   0x5   :  { %18 = vsyncpa [#allocation5], 0 }
   0x6   :  { %20 = vsyncpa [#allocation5 + $0x1], 0 }
   0x7   :  { %21 = vsyncpa [#allocation11], 0 }
   0x8   :  { %23 = vsyncpa [#allocation11 + $0x1], 0  ;;  %s1694_s26 = smov 0   ;;  %s1696_s27 = smov 0  }
   0x9   :  { %s1698_s28 = smov 0   ;;  %s1700_s29 = smov 0  }
   0xa   :  { %s1702_s30 = smov 0   ;;  %s1704_s8 = smov 0  }
   0xb LB: > { %s987_s5 = sadd.s32 4294967295, %s1638_s8   ;;  %s988_s9 = sadd.s32 4294967294, %s1638_s8   ;;  %s1638_s8 = sphi %s1704_s8, %s29_s8   ;;  %s1634_s30 = sphi %s1702_s30, %s2207_s30   ;;  %s1630_s29 = sphi %s1700_s29, %s2206_s29   ;;  %s1626_s28 = sphi %s1698_s28, %s2205_s28   ;;  %s1622_s27 = sphi %s1696_s27, %s2204_s27   ;;  %s1618_s26 = sphi %s1694_s26, %s2203_s26  }
   0xc   : > { %p63_p0 = scmp.ne.s32.totalorder %s1622_s27, %s1618_s26  ;;  %p1728_p1 = scmp.eq.s32.totalorder %s987_s5, 0 }
   0xd   : > { %p1732_p2 = scmp.eq.s32.totalorder %s987_s5, 1  ;;  %p205_p3 = scmp.eq.s32.totalorder %s988_s9, 1 }
   0xe   : > { %s2179_s10 = scalar_select %p1728_p1, 1, 0 }
   0xf   : > { %s2180_s11 = scalar_select %p1732_p2, 1, 0 }
  0x10   : > { %p1738_p4 = por %p1728_p1, %p63_p0  ;;  %p989_p5 = scmp.ge.s32.totalorder %s1638_s8, 1 }
  0x11   : > { %p1743_p6 = por %p205_p3, %p63_p0  ;;  %p240_p7 = scmp.lt.s32.totalorder %s1638_s8, 3 }
  0x12   : > { %s2181_s12 = scalar_select %p1738_p4, 1, 0 }
  0x13   : > { %s2182_s13 = scalar_select %p1743_p6, 1, 0 }
  0x14   : > { %p1748_p8 = pnand %p989_p5, %p240_p7  ;;  %s1640_s15 = smov [#allocation6]  }
  0x15   : > { %s255_s16 = sshll.u32 %s1640_s15, 4  ;;  %s1641_s17 = smov [#allocation8]   ;;  %s256_s16 = int_to_ptr.vmem [resolvable:$true] %s255_s16 }
  0x16   : > { %s2183_s14 = scalar_select %p1748_p8, 1, 0 }
  0x17   : > { %p1338_p10 = pneg %p1748_p8  ;;  %s268_s18 = sshll.u32 %s1641_s17, 4  ;;  %s1761_s18 = int_to_ptr.vmem [resolvable:$true] %s268_s18 }
  0x18   : > { %s1434_s22 = scalar_lea.hbm %s2168_s1, 128 }
  0x19   : > { %p1757_p11 = pnand %p1338_p10, %p1728_p1  ;;  %p1435_p12 = scmp.ne.s32.totalorder %s2168_s1, %s1434_s22 }
  0x1a   : > { %p1441_p5 = scmp.lt.u32.totalorder %s1434_s22, %s2168_s1 }
  0x1b   : > { %p1436_p13 = pneg %p1757_p11 }
  0x1d   : > { %p1437_p0 = pnand %p1436_p13, %p1435_p12 }
  0x1f   : > { %p1438_p3 = pneg %p1437_p0 }
  0x21   : > { %p1443_p7 = pnand %p1441_p5, %p1438_p3 }
  0x23   : > { %1446 = shalt.err (!%p1443_p7)
}
  0x24   : > { %s1447_s9 = scalar_lea.vmem %s256_s16, 128  ;;  %p1455_p1 = scmp.lt.s32.totalorder %s256_s16, %s256_s16 }
  0x25   : > { %p1448_p10 = scmp.ne.s32.totalorder %s256_s16, %s1447_s9  ;;  %p1456_p4 = scmp.lt.s32.totalorder %s1447_s9, %s1447_s9 }
  0x27   : > { %p1450_p9 = pnand %p1448_p10, %p1436_p13  ;;  %p1457_p8 = por %p1456_p4, %p1455_p1 }
  0x29   : > { %p1451_p6 = pneg %p1450_p9 }
  0x2b   : > { %p1458_p2 = pnand %p1457_p8, %p1451_p6 }
  0x2d   : > { %1461 = shalt.err (!%p1458_p2)
}
  0x2e   : > { %1341 = dma.hbm_to_vmem [thread:$0]  (!%p1757_p11), %s2168_s1, 128, %s256_s16, [#allocation7]  }
  0x2f   : > { %s1462_s22 = scalar_lea.hbm %s2170_s3, 2048 }
  0x30   : > { %p1463_p9 = scmp.ne.s32.totalorder %s2170_s3, %s1462_s22  ;;  %p1469_p2 = scmp.lt.u32.totalorder %s1462_s22, %s2170_s3 }
  0x32   : > { %p1465_p1 = pnand %p1463_p9, %p1436_p13 }
  0x34   : > { %p1466_p4 = pneg %p1465_p1 }
  0x36   : > { %p1471_p6 = pnand %p1469_p2, %p1466_p4 }
  0x38   : > { %1474 = shalt.err (!%p1471_p6)
}
  0x39   : > { %s1475_s16 = scalar_lea.vmem %s1761_s18, 2048  ;;  %p1483_p3 = scmp.lt.s32.totalorder %s1761_s18, %s1761_s18 }
  0x3a   : > { %p1476_p8 = scmp.ne.s32.totalorder %s1761_s18, %s1475_s16  ;;  %p1484_p5 = scmp.lt.s32.totalorder %s1475_s16, %s1475_s16 }
  0x3c   : > { %p1478_p12 = pnand %p1476_p8, %p1436_p13  ;;  %p1485_p7 = por %p1484_p5, %p1483_p3 }
  0x3e   : > { %p1479_p0 = pneg %p1478_p12 }
  0x40   : > { %p1486_p10 = pnand %p1485_p7, %p1479_p0 }
  0x42   : > { %1489 = shalt.err (!%p1486_p10)
}
  0x43   : > { %s1642_s9 = smov 128   ;;  %s1643_s15 = smov 8  }
  0x44   : > { %1344 = dma.hbm_to_vmem [thread:$0]  (!%p1757_p11), %s2170_s3, 2048, %s1761_s18, [#allocation7], %s1642_s9, %s1642_s9, %s1643_s15  }
  0x45   : > { %s41_s21 = sadd.s32 1, %s1634_s30  ;;  %s50_s22 = sadd.s32 1, %s1626_s28 }
  0x46   : > { %p43_p13 = scmp.ge.s32.totalorder %s41_s21, 2  ;;  %p57_p9 = scmp.ne.s32.totalorder %s1626_s28, %s1622_s27 }
  0x47   : > { %p58_p1 = scmp.eq.s32.totalorder %s1638_s8, 0  ;;  %p1358_p4 = scmp.lt.s32.totalorder %s1638_s8, 2 }
  0x48   : > { %s2209_s21 = smov (%p43_p13, %s41_s21), 0  ;;  %p2185_p6 = scmp.ne.s32.totalorder %s2180_s11, 0 }
  0x49   : > { %p59_p2 = por %p58_p1, %p57_p9  ;;  %s45_s19 = ssub.s32 %s1634_s30, %s2209_s21 }
  0x4a   : > { %p1820_p8 = por %p2185_p6, %p57_p9  ;;  %s288_s24 = sand.u32 1, %s1626_s28  }
  0x4b   : > { %p48_p12 = scmp.eq.s32.totalorder %s45_s19, 0  ;;  %s993_s18 = sshll.u32 %s288_s24, 3 }
  0x4c   : > { %s994_s25 = sshll.u32 %s1634_s30, 7  ;;  %s292_s11 = scalar_lea.vmem [#allocation3], %s993_s18 }
  0x4d   : > { %s1829_s5 = scalar_select %p48_p12, %s1626_s28, %s50_s22  }
  0x4e   : > { %s1834_s15 = scalar_lea.hbm %s2167_s0, %s994_s25  ;;  %s300_s17 = sshll.u32 %s292_s11, 4  ;;  %s1842_s17 = int_to_ptr.vmem [resolvable:$true] %s300_s17 }
  0x4f   : > { %p1838_p11 = pnand %p1358_p4, %p59_p2  ;;  %s289_s22 = scalar_lea.sflag [#allocation4], %s288_s24 }
  0x50   : > { %s1490_s19 = scalar_lea.hbm %s1834_s15, 128  ;;  %s1495_s16 = scalar_lea.hbm %s2167_s0, 256 }
  0x51   : > { %p1491_p0 = scmp.ne.s32.totalorder %s1834_s15, %s1490_s19  ;;  %p1492_p3 = pneg %p1838_p11 }
  0x52   : > { %p1496_p10 = scmp.lt.u32.totalorder %s1834_s15, %s2167_s0  ;;  %p1497_p13 = scmp.lt.u32.totalorder %s1495_s16, %s1490_s19 }
  0x53   : > { %p1493_p5 = pnand %p1492_p3, %p1491_p0  ;;  %p1499_p1 = scmp.lt.u32.totalorder %s1490_s19, %s1834_s15 }
  0x54   : > { %p1498_p9 = por %p1497_p13, %p1496_p10 }
  0x55   : > { %p1494_p7 = pneg %p1493_p5 }
  0x56   : > { %p1500_p4 = por %p1499_p1, %p1498_p9 }
  0x58   : > { %p1501_p2 = pnand %p1500_p4, %p1494_p7 }
  0x5a   : > { %1504 = shalt.err (!%p1501_p2)
}
  0x5b   : > { %s1505_s24 = scalar_lea.vmem %s1842_s17, 128  ;;  %s1644_s18 = smov [#allocation3]  }
  0x5c   : > { %p1506_p6 = scmp.ne.s32.totalorder %s1842_s17, %s1505_s24  ;;  %s1510_s25 = sshll.u32 %s1644_s18, 4  ;;  %s1511_s25 = int_to_ptr.vmem [resolvable:$false] %s1510_s25 }
  0x5d   : > { %s1512_s9 = scalar_lea.vmem %s1511_s25, 256  ;;  %p1513_p5 = scmp.lt.s32.totalorder %s1842_s17, %s1511_s25 }
  0x5e   : > { %p1508_p12 = pnand %p1506_p6, %p1492_p3  ;;  %p1514_p10 = scmp.lt.s32.totalorder %s1512_s9, %s1505_s24 }
  0x60   : > { %p1509_p0 = pneg %p1508_p12  ;;  %p1515_p13 = por %p1514_p10, %p1513_p5 }
  0x62   : > { %p1516_p9 = pnand %p1515_p13, %p1509_p0 }
  0x64   : > { %1519 = shalt.err (!%p1516_p9)
}
  0x65   : > { %1348 = dma.hbm_to_vmem [thread:$0]  (!%p1838_p11), %s1834_s15, 128, %s1842_s17, %s289_s22  }
  0x66   : > { %p2188_p7 = scmp.ne.s32.totalorder %s2183_s14, 0 }
  0x67   : > { %s1872_s19 = sand.u32 (!%p2188_p7), 1, %s1622_s27   ;;  %p2189_p3 = scmp.ne.s32.totalorder (!%p2188_p7), %s2181_s12, 0 }
  0x68   : > { %309 = sbr.rel (%p2188_p7) target bundleno = 1038 (0x40e), region = 44  ;;  %s1875_s16 = sshll.u32 (!%p2188_p7), %s1872_s19, 3 }
  0x69   : > { %s312_s11 = scalar_lea.sflag (!%p2188_p7), [#allocation4], %s1872_s19  ;;  %s315_s24 = scalar_lea.vmem (!%p2188_p7), [#allocation3], %s1875_s16 }
  0x6f   : > { %1601 = dma.done.wait (%p2189_p3), %s312_s11, 128  }
  0x70   : > { %1603 = vsyncadd (%p2189_p3), %s312_s11, 4294967168  ;;  %p2190_p11 = scmp.ne.s32.totalorder %s2179_s10, 0 }
  0x72   : > { %1605 = dma.done.wait (%p2190_p11), [#allocation7], 2176  }
  0x73   : > { %1607 = vsyncadd (%p2190_p11), [#allocation7], 4294965120  ;;  %v1645_v0 = vmov 0.0|0.0   ;;  %vm1646_vm0 = vmmov 0   ;;  %v1647_v1 = vmov 0.0   ;;  %v361_v2 = vld [vmem:[#allocation8] sm:$0xff] }
  0x74   : > { %1228 = vmatprep.subr.bf16.mxu0 %v1645_v0  ;;  %1120 = vmatprep.mubr.msk.f32.mxu0 %vm1646_vm0, %v1647_v1  ;;  %v362_v3 = vld [vmem:[#allocation8 + $0x8] sm:$0xff]  ;;  %v363_v4 = vld [vmem:[#allocation8 + $0x10] sm:$0xff]  ;;  %v364_v6 = vld [vmem:[#allocation8 + $0x18] sm:$0xff]  ;;  %s379_s25 = sld [smem:[#allocation2]]  ;;  %vm1648_vm2 = vmmov 1   ;;  %s1016_s12 = sshll.u32 %s1630_s29, 7 }
  0x75   : > { %1252 = vmatprep.subr.bf16.mxu1 %v1645_v0  ;;  %1155 = vmatprep.mubr.msk.f32.mxu1 %vm1646_vm0, %v1647_v1  ;;  %v1893_v5 = vpack.c.bf16 %v362_v3, %v361_v2  ;;  %v1896_v7 = vpack.c.bf16 %v364_v6, %v363_v4  ;;  %v365_v8 = vld [vmem:[#allocation8 + $0x20] sm:$0xff]  ;;  %v366_v9 = vld [vmem:[#allocation8 + $0x28] sm:$0xff]  ;;  %v1901_v11 = vld [vmem:[#allocation6] sm:$0xff]  ;;  %s358_s14 = scalar_lea.vmem [#allocation10], %s1875_s16  ;;  %s2078_s22 = scalar_lea.hbm %s2174_s7, %s1016_s12 }
  0x76   : > { %v359_v10 = vld [vmem:[%s315_s24] sm:$0xff]  ;;  %v1908_v14 = vpack.c.bf16 %v366_v9, %v365_v8  ;;  %v368_v17 = vld [vmem:[#allocation8 + $0x38] sm:$0xff]  ;;  %v369_v21 = vld [vmem:[#allocation8 + $0x40] sm:$0xff]  ;;  %s853_s15 = sshll.u32 %s358_s14, 4  ;;  %s825_s18 = scalar_lea.sflag [#allocation11], %s1872_s19  ;;  %s2080_s15 = int_to_ptr.vmem [resolvable:$true] %s853_s15 }
  0x77   : > { %1230 = vmatpush3.bf16.msra.mxu0 %v1893_v5  ;;  %1254 = vmatpush3.bf16.msra.mxu1 %v1893_v5  ;;  %v380_v12 = vadd.f32 %v1901_v11, %v359_v10  ;;  %v1001_v13 = vld [vmem:[%s2169_s2] ss:$0 sm:$0xff]  ;;  %v367_v16 = vld [vmem:[#allocation8 + $0x30] sm:$0xff]  ;;  %v372_v25 = vld [vmem:[#allocation8 + $0x58] sm:$0xff]  ;;  %s1649_s9 = smov [#allocation10]  }
  0x78   : > { %1231 = vmatprep.subr.bf16.mxu0 %v1645_v0  ;;  %1255 = vmatprep.subr.bf16.mxu1 %v1645_v0  ;;  %v1913_v15 = vld [vmem:[%s2171_s4] ss:$0 sm:$0xff]  ;;  %v1920_v20 = vpack.c.bf16 %v368_v17, %v367_v16  ;;  %v371_v24 = vld [vmem:[#allocation8 + $0x50] sm:$0xff]  ;;  %v373_v27 = vld [vmem:[#allocation8 + $0x60] sm:$0xff]  ;;  %s1524_s11 = sshll.u32 %s1649_s9, 4  ;;  %s1525_s11 = int_to_ptr.vmem [resolvable:$false] %s1524_s11 }
  0x79   : > { %v386_v18 = vadd.f32 %v1001_v13, %v380_v12  ;;  %v370_v22 = vld [vmem:[#allocation8 + $0x48] sm:$0xff]  ;;  %v1244_v26 = vpack.c.bf16 %v372_v25, %v371_v24  ;;  %v375_v30 = vld [vmem:[#allocation8 + $0x70] sm:$0xff]  ;;  %v376_v31 = vld [vmem:[#allocation8 + $0x78] sm:$0xff]  ;;  %s1526_s24 = scalar_lea.vmem %s1525_s11, 256  ;;  %p1527_p6 = scmp.lt.s32.totalorder %s2080_s15, %s1525_s11 }
  0x7a   : > { %v1926_v23 = vpack.c.bf16 %v370_v22, %v369_v21  ;;  %v374_v28 = vld [vmem:[#allocation8 + $0x68] sm:$0xff]  ;;  %v1250_v32 = vpack.c.bf16 %v376_v31, %v375_v30  ;;  %v1980_v41 = vstv %s379_s25  ;;  %s1520_s25 = scalar_lea.vmem %s2080_s15, 128 }
  0x7b   : > { %1233 = vmatpush3.bf16.msra.mxu0 %v1896_v7  ;;  %1257 = vmatpush3.bf16.msra.mxu1 %v1896_v7  ;;  %v391_v19 = vmul.f32 %v1913_v15, %v386_v18  ;;  %v1247_v29 = vpack.c.bf16 %v374_v28, %v373_v27  ;;  %v1958_v33 = vld [vmem:[%s2171_s4 + $0x1] ss:$0 sm:$0xff]  ;;  %p1521_p1 = scmp.ne.s32.totalorder %s2080_s15, %s1520_s25  ;;  %p1528_p12 = scmp.lt.s32.totalorder %s1526_s24, %s1520_s25 }
  0x7c   : > { %1234 = vmatprep.subr.bf16.mxu0 %v1645_v0  ;;  %1258 = vmatprep.subr.bf16.mxu1 %v1645_v0  ;;  %v1005_v37 = vld [vmem:[%s2169_s2 + $0x1] ss:$0 sm:$0xff] }
  0x7d   : > { %392 = vadd.xlane.f32.xlu0 %v391_v19  ;;  %p1522_p4 = pnand %p1521_p1, %p1820_p8  ;;  %p1529_p0 = por %p1528_p12, %p1527_p6 }
  0x7f   : > { %1236 = vmatpush3.bf16.msra.mxu0 %v1908_v14  ;;  %1260 = vmatpush3.bf16.msra.mxu1 %v1908_v14  ;;  %p1523_p2 = pneg %p1522_p4 }
  0x80   : > { %1237 = vmatprep.subr.bf16.mxu0 %v1645_v0  ;;  %1261 = vmatprep.subr.bf16.mxu1 %v1645_v0 }
  0x81   : > { %p1530_p5 = pnand %p1529_p0, %p1523_p2 }
  0x83   : > { %1239 = vmatpush3.bf16.msra.mxu0 %v1920_v20  ;;  %1263 = vmatpush3.bf16.msra.mxu1 %v1920_v20 }
  0x84   : > { %1240 = vmatprep.subr.bf16.mxu0 %v1645_v0  ;;  %1264 = vmatprep.subr.bf16.mxu1 %v1645_v0 }
  0x87   : > { %1242 = vmatpush3.bf16.msra.mxu0 %v1926_v23  ;;  %1266 = vmatpush3.bf16.msra.mxu1 %v1926_v23 }
  0x88   : > { %1243 = vmatprep.subr.bf16.mxu0 %v1645_v0  ;;  %1267 = vmatprep.subr.bf16.mxu1 %v1645_v0 }
  0x8b   : > { %1245 = vmatpush3.bf16.msra.mxu0 %v1244_v26  ;;  %1269 = vmatpush3.bf16.msra.mxu1 %v1244_v26 }
  0x8c   : > { %1246 = vmatprep.subr.bf16.mxu0 %v1645_v0  ;;  %1270 = vmatprep.subr.bf16.mxu1 %v1645_v0 }
  0x8f   : > { %1248 = vmatpush3.bf16.msra.mxu0 %v1247_v29  ;;  %1272 = vmatpush3.bf16.msra.mxu1 %v1247_v29 }
  0x90   : > { %1249 = vmatprep.subr.bf16.mxu0 %v1645_v0  ;;  %1273 = vmatprep.subr.bf16.mxu1 %v1645_v0 }
  0x93   : > { %1251 = vmatpush3.bf16.msra.mxu0 %v1250_v32  ;;  %1275 = vmatpush3.bf16.msra.mxu1 %v1250_v32 }
  0x94   : > { %1276 = vmatprep.subr.bf16.mxu0 %v1645_v0  ;;  %1300 = vmatprep.subr.bf16.mxu1 %v1645_v0 }
  0x96   : > { %1121 = vmatmul.mubr.f32.vlgmr.msra.gmra.mrb[0].mxu0 %v386_v18 }
  0x97   : > { %1278 = vmatpush3.bf16.msra.mxu0 %v1893_v5  ;;  %1190 = vmatprep.mubr.msk.f32.mxu0 %vm1646_vm0, %v1647_v1 }
  0x98   : > { %1279 = vmatprep.subr.bf16.mxu0 %v1645_v0 }
  0x9b   : > { %1281 = vmatpush3.bf16.msra.mxu0 %v1896_v7 }
  0x9c   : > { %1282 = vmatprep.subr.bf16.mxu0 %v1645_v0 }
  0x9f   : > { %1284 = vmatpush3.bf16.msra.mxu0 %v1908_v14 }
  0xa0   : > { %1285 = vmatprep.subr.bf16.mxu0 %v1645_v0 }
  0xa3   : > { %1287 = vmatpush3.bf16.msra.mxu0 %v1920_v20 }
  0xa4   : > { %1288 = vmatprep.subr.bf16.mxu0 %v1645_v0 }
  0xa7   : > { %1290 = vmatpush3.bf16.msra.mxu0 %v1926_v23 }
  0xa8   : > { %1291 = vmatprep.subr.bf16.mxu0 %v1645_v0 }
  0xab   : > { %1293 = vmatpush3.bf16.msra.mxu0 %v1244_v26 }
  0xac   : > { %1294 = vmatprep.subr.bf16.mxu0 %v1645_v0 }
  0xaf   : > { %1296 = vmatpush3.bf16.msra.mxu0 %v1247_v29 }
  0xb0   : > { %1297 = vmatprep.subr.bf16.mxu0 %v1645_v0 }
  0xb3   : > { %1299 = vmatpush3.bf16.msra.mxu0 %v1250_v32 }
 0x10a   : > { %v393_v42 = vpop.xlane.xlu0 %392 }
 0x10b   : > { %v395_v43 = vadd.f32 %v1980_v41, %v393_v42 }
 0x10d   : > { %v1003_v44 = vmul.f32 -1.442695, %v395_v43 }
 0x10f   : > { %1418 = vpow2.f32 %v1003_v44 }
 0x119   : > { %v1419_v48 = vpop.eup %1418 }
 0x11a   : > { %v399_v49 = vadd.f32 1.0, %v1419_v48 }
 0x169   : > { %v472_v34 = vpop.f32.mrb[0].mxu0 }
 0x16a   : > { %v473_v35 = vadd.f32 %v1958_v33, %v472_v34  ;;  %v1122_v36 = vpop.f32.mrb[1].mxu0 }
 0x16c   : > { %v494_v38 = vadd.f32 %v473_v35, %v1901_v11 }
 0x16e   : > { %v500_v39 = vadd.f32 %v1005_v37, %v494_v38 }
 0x170   : > { %1156 = vmatmul.mubr.f32.vlgmr.msra.gmra.mrb[0].mxu1 %v500_v39  ;;  %v501_v40 = vmul.f32 %v1913_v15, %v500_v39 }
 0x171   : > { %1302 = vmatpush3.bf16.msra.mxu1 %v1893_v5  ;;  %1225 = vmatprep.mubr.msk.f32.mxu1 %vm1646_vm0, %v1647_v1  ;;  %v1008_v5 = vld [vmem:[%s2169_s2 + $0x2] ss:$0 sm:$0xff] }
 0x172   : > { %502 = vadd.xlane.f32.xlu0 %v501_v40  ;;  %1303 = vmatprep.subr.bf16.mxu1 %v1645_v0 }
 0x175   : > { %1305 = vmatpush3.bf16.msra.mxu1 %v1896_v7 }
 0x176   : > { %1306 = vmatprep.subr.bf16.mxu1 %v1645_v0 }
 0x179   : > { %1308 = vmatpush3.bf16.msra.mxu1 %v1908_v14 }
 0x17a   : > { %1309 = vmatprep.subr.bf16.mxu1 %v1645_v0 }
 0x17d   : > { %1311 = vmatpush3.bf16.msra.mxu1 %v1920_v20 }
 0x17e   : > { %1312 = vmatprep.subr.bf16.mxu1 %v1645_v0 }
 0x181   : > { %1314 = vmatpush3.bf16.msra.mxu1 %v1926_v23 }
 0x182   : > { %1315 = vmatprep.subr.bf16.mxu1 %v1645_v0 }
 0x185   : > { %1317 = vmatpush3.bf16.msra.mxu1 %v1244_v26 }
 0x186   : > { %1318 = vmatprep.subr.bf16.mxu1 %v1645_v0 }
 0x189   : > { %1320 = vmatpush3.bf16.msra.mxu1 %v1247_v29 }
 0x18a   : > { %1321 = vmatprep.subr.bf16.mxu1 %v1645_v0 }
 0x18d   : > { %1323 = vmatpush3.bf16.msra.mxu1 %v1250_v32  ;;  %v1011_v32 = vld [vmem:[%s2169_s2 + $0x3] ss:$0 sm:$0xff] }
 0x1ff   : > { %v503_v45 = vpop.xlane.xlu0 %502 }
 0x200   : > { %v504_v46 = vadd.f32 %v503_v45, %v1980_v41 }
 0x202   : > { %v1006_v47 = vmul.f32 -1.442695, %v504_v46 }
 0x204   : > { %1420 = vpow2.f32 %v1006_v47 }
 0x205   : > { %1422 = vrcp.f32 %v399_v49 }
 0x20e   : > { %v1421_v50 = vpop.eup %1420 }
 0x20f   : > { %v508_v51 = vadd.f32 1.0, %v1421_v50  ;;  %v1423_v52 = vpop.eup %1422 }
 0x210   : > { %vm478_vm1 = vcmp.gt.f32.partialorder %v1423_v52, 0.9 }
 0x211   : > { %1424 = vrcp.f32 %v508_v51  ;;  %vm480_vm3 = vmxor %vm478_vm1, %vm1648_vm2  ;;  %v812_v51 = vlaneseq }
 0x212   : > { %v482_v53 = vsel %vm480_vm3, %v1423_v52, 0.0 }
 0x213   : > { %v1985_v55 = vsel %vm478_vm1, 1.0, %v482_v53  ;;  %v483_v59 = vsub.f32 1.0, %v482_v53 }
 0x214   : > { %vm581_vm5 = vcmp.lt.f32.partialorder %v1985_v55, 1.0 }
 0x215   : > { %v485_v61 = vsel %vm478_vm1, %v483_v59, 0.0  ;;  %v491_v62 = vsel %vm478_vm1, %v483_v59, %v482_v53 }
 0x216   : > { %v492_v2 = vmul.f32 %v491_v62, %v473_v35 }
 0x21b   : > { %v1425_v54 = vpop.eup %1424 }
 0x21c   : > { %v582_v56 = vadd.f32 %v1425_v54, %v1985_v55 }
 0x21e   : > { %vm583_vm4 = vcmp.gt.f32.partialorder %v582_v56, 0.9 }
 0x21f   : > { %vm585_vm6 = vmxor %vm583_vm4, %vm1648_vm2 }
 0x220   : > { %vm1993_vm7 = vmand %vm581_vm5, %vm585_vm6 }
 0x221   : > { %v587_v58 = vsel %vm1993_vm7, %v582_v56, %v1985_v55  ;;  %vm2007_vm8 = vmand %vm581_vm5, %vm583_vm4  ;;  %v595_v7 = vsel %vm1993_vm7, %v1425_v54, 0.0  ;;  %v813_v54 = vand.u32 127, %v812_v51 }
 0x222   : > { %v588_v60 = vsub.f32 1.0, %v587_v58  ;;  %v591_v23 = vsel %vm2007_vm8, 1.0, %v587_v58 }
 0x223   : > { %vm687_vm11 = vcmp.lt.f32.partialorder %v591_v23, 1.0  ;;  %vm814_vm3 = vcmp.eq.s32.totalorder %v813_v54, 0 }
 0x224   : > { %v589_v0 = vadd.f32 %v588_v60, %v485_v61  ;;  %v1010_v52 = vsel %vm687_vm11, 1.0, %v1647_v1 }
 0x226   : > { %v596_v10 = vsel %vm2007_vm8, %v589_v0, %v595_v7  ;;  %v590_v27 = vsel %vm2007_vm8, %v589_v0, %v485_v61 }
 0x243   : > { %v577_v63 = vpop.f32.mrb[0].mxu1 }
 0x244   : > { %v578_v3 = vadd.f32 %v1958_v33, %v577_v63  ;;  %v1157_v4 = vpop.f32.mrb[1].mxu1 }
 0x246   : > { %v597_v8 = vsub.f32 %v578_v3, %v492_v2  ;;  %v600_v9 = vadd.f32 %v578_v3, %v1901_v11 }
 0x248   : > { %v598_v12 = vmul.f32 %v597_v8, %v596_v10  ;;  %v606_v13 = vadd.f32 %v1008_v5, %v600_v9 }
 0x24a   : > { %1191 = vmatmul.mubr.f32.vlgmr.msra.gmra.mrb[2].mxu0 %v606_v13  ;;  %v607_v14 = vmul.f32 %v1913_v15, %v606_v13  ;;  %v599_v16 = vadd.f32 %v598_v12, %v492_v2 }
 0x24c   : > { %608 = vadd.xlane.f32.xlu1 %v607_v14 }
 0x2d9   : > { %v609_v17 = vpop.xlane.xlu1 %608 }
 0x2da   : > { %v610_v18 = vadd.f32 %v609_v17, %v1980_v41 }
 0x2dc   : > { %v1009_v19 = vmul.f32 -1.442695, %v610_v18 }
 0x2de   : > { %1426 = vpow2.f32 %v1009_v19 }
 0x2e8   : > { %v1427_v20 = vpop.eup %1426 }
 0x2e9   : > { %v614_v21 = vadd.f32 1.0, %v1427_v20 }
 0x2eb   : > { %1428 = vrcp.f32 %v614_v21 }
 0x2f5   : > { %v1429_v22 = vpop.eup %1428 }
 0x2f6   : > { %v688_v24 = vadd.f32 %v1429_v22, %v591_v23 }
 0x2f8   : > { %vm689_vm9 = vcmp.gt.f32.partialorder %v688_v24, 0.9 }
 0x2f9   : > { %vm691_vm10 = vmxor %vm689_vm9, %vm1648_vm2 }
 0x2fa   : > { %vm692_vm12 = vmand %vm687_vm11, %vm691_vm10 }
 0x2fb   : > { %v693_v25 = vsel %vm692_vm12, %v688_v24, %v591_v23  ;;  %vm2029_vm13 = vmand %vm687_vm11, %vm689_vm9  ;;  %v701_v35 = vsel %vm692_vm12, %v1429_v22, 0.0 }
 0x2fc   : > { %v694_v26 = vsub.f32 1.0, %v693_v25  ;;  %v697_v49 = vsel %vm2029_vm13, 1.0, %v693_v25 }
 0x2fd   : > { %vm793_vm14 = vcmp.lt.f32.partialorder %v697_v49, 1.0 }
 0x2fe   : > { %v695_v29 = vadd.f32 %v694_v26, %v590_v27  ;;  %v1013_v53 = vsel %vm793_vm14, 1.0, %v1647_v1 }
 0x300   : > { %v702_v38 = vsel %vm2029_vm13, %v695_v29, %v701_v35  ;;  %v696_v60 = vsel %vm2029_vm13, %v695_v29, %v590_v27 }
 0x31d   : > { %v683_v28 = vpop.f32.mrb[2].mxu0 }
 0x31e   : > { %v684_v30 = vadd.f32 %v1958_v33, %v683_v28  ;;  %v1192_v31 = vpop.f32.mrb[3].mxu0 }
 0x320   : > { %v703_v36 = vsub.f32 %v684_v30, %v599_v16  ;;  %v706_v37 = vadd.f32 %v684_v30, %v1901_v11  ;;  %v1007_v11 = vsel %vm581_vm5, 1.0, %v1647_v1 }
 0x322   : > { %v704_v39 = vmul.f32 %v703_v36, %v702_v38  ;;  %v712_v40 = vadd.f32 %v1011_v32, %v706_v37 }
 0x324   : > { %1226 = vmatmul.mubr.f32.vlgmr.msra.gmra.mrb[2].mxu1 %v712_v40  ;;  %v713_v42 = vmul.f32 %v1913_v15, %v712_v40  ;;  %v2037_v43 = vadd.f32 %v704_v39, %v599_v16 }
 0x326   : > { %714 = vadd.xlane.f32.xlu1 %v713_v42 }
 0x3b3   : > { %v715_v44 = vpop.xlane.xlu1 %714 }
 0x3b4   : > { %v716_v45 = vadd.f32 %v715_v44, %v1980_v41  ;;  %v594_v41 = vadd.f32 1.0, %v1007_v11 }
 0x3b6   : > { %v1012_v46 = vmul.f32 -1.442695, %v716_v45  ;;  %v700_v55 = vadd.f32 %v1010_v52, %v594_v41 }
 0x3b8   : > { %1430 = vpow2.f32 %v1012_v46  ;;  %v805_v59 = vadd.f32 %v1013_v53, %v700_v55 }
 0x3c2   : > { %v1431_v47 = vpop.eup %1430 }
 0x3c3   : > { %v720_v48 = vadd.f32 1.0, %v1431_v47 }
 0x3c5   : > { %1432 = vrcp.f32 %v720_v48 }
 0x3cf   : > { %v2045_v50 = vpop.eup %1432 }
 0x3d0   : > { %v794_v15 = vadd.f32 %v2045_v50, %v697_v49 }
 0x3d2   : > { %vm795_vm15 = vcmp.gt.f32.partialorder %v794_v15, 0.9 }
 0x3d3   : > { %vm797_vm0 = vmxor %vm795_vm15, %vm1648_vm2  ;;  %vm815_vm2 = vcmp.eq.s32.totalorder %v813_v54, 1 }
 0x3d4   : > { %vm2055_vm1 = vmand %vm793_vm14, %vm797_vm0  ;;  %v816_v63 = vsel %vm815_vm2, %v805_v59, 0.0 }
 0x3d5   : > { %v799_v57 = vsel %vm2055_vm1, %v794_v15, %v697_v49  ;;  %vm2067_vm4 = vmand %vm793_vm14, %vm795_vm15 }
 0x3d6   : > { %v800_v58 = vsub.f32 1.0, %v799_v57 }
 0x3d8   : > { %v801_v1 = vadd.f32 %v800_v58, %v696_v60 }
 0x3da   : > { %v802_v62 = vsel %vm2067_vm4, %v801_v1, %v696_v60 }
 0x3db   : > { %v817_v0 = vsel %vm814_vm3, %v802_v62, %v816_v63 }
 0x3dc   : > { %818 = vst [vmem:[%s358_s14] sm:$0xff] %v817_v0 }
 0x3dd   : > { %1533 = shalt.err (!%p1530_p5)
}
 0x3de   : > { %s1534_s10 = scalar_lea.hbm %s2078_s22, 128  ;;  %s1538_s20 = scalar_lea.hbm %s2174_s7, 256 }
 0x3df   : > { %p1535_p10 = scmp.ne.s32.totalorder %s2078_s22, %s1534_s10  ;;  %p1539_p7 = scmp.lt.u32.totalorder %s2078_s22, %s2174_s7 }
 0x3e0   : > { %p1540_p3 = scmp.lt.u32.totalorder %s1538_s20, %s1534_s10  ;;  %p1542_p1 = scmp.lt.u32.totalorder %s1534_s10, %s2078_s22 }
 0x3e1   : > { %p1536_p13 = pnand %p1535_p10, %p1820_p8 }
 0x3e2   : > { %p1541_p11 = por %p1540_p3, %p1539_p7 }
 0x3e3   : > { %p1537_p9 = pneg %p1536_p13 }
 0x3e4   : > { %p1543_p4 = por %p1542_p1, %p1541_p11 }
 0x3e6   : > { %p1544_p2 = pnand %p1543_p4, %p1537_p9 }
 0x3e8   : > { %1547 = shalt.err (!%p1544_p2)
}
 0x3e9   : > { %1335 = dma.vmem_to_hbm [thread:$0]  (%p1820_p8), %s2080_s15, 128, %s2078_s22, %s825_s18   ;;  %v806_v5 = vsel %vm2055_vm1, %v2045_v50, 0.0 }
 0x3ea   : > { %v807_v7 = vsel %vm2067_vm4, %v801_v1, %v806_v5  ;;  %s351_s25 = scalar_lea.vmem [#allocation9], %s1875_s16  ;;  %s2118_s18 = scalar_lea.hbm %s2173_s6, %s1016_s12 }
 0x3eb   : > { %s839_s24 = sshll.u32 %s351_s25, 4  ;;  %s820_s10 = scalar_lea.sflag [#allocation5], %s1872_s19  ;;  %s2120_s24 = int_to_ptr.vmem [resolvable:$true] %s839_s24 }
 0x3ec   : > { %s1548_s14 = scalar_lea.vmem %s2120_s24, 128  ;;  %s1650_s16 = smov [#allocation9]  }
 0x3ed   : > { %p1549_p6 = scmp.ne.s32.totalorder %s2120_s24, %s1548_s14  ;;  %s1552_s17 = sshll.u32 %s1650_s16, 4  ;;  %s1553_s17 = int_to_ptr.vmem [resolvable:$false] %s1552_s17 }
 0x3ee   : > { %s1554_s29 = scalar_lea.vmem %s1553_s17, 256  ;;  %p1555_p5 = scmp.lt.s32.totalorder %s2120_s24, %s1553_s17 }
 0x3ef   : > { %p1550_p12 = pnand %p1549_p6, %p1820_p8  ;;  %p1556_p10 = scmp.lt.s32.totalorder %s1554_s29, %s1548_s14 }
 0x3f1   : > { %p1551_p0 = pneg %p1550_p12  ;;  %p1557_p13 = por %p1556_p10, %p1555_p5 }
 0x3f3   : > { %p1558_p9 = pnand %p1557_p13, %p1551_p0 }
 0x3f7   : > { %v789_v2 = vpop.f32.mrb[2].mxu1 }
 0x3f8   : > { %v790_v3 = vadd.f32 %v1958_v33, %v789_v2  ;;  %v1227_v4 = vpop.f32.mrb[3].mxu1 }
 0x3fa   : > { %v808_v6 = vsub.f32 %v790_v3, %v2037_v43 }
 0x3fc   : > { %v809_v8 = vmul.f32 %v808_v6, %v807_v7 }
 0x3fe   : > { %v810_v9 = vadd.f32 %v809_v8, %v2037_v43 }
 0x400   : > { %811 = vst [vmem:[%s351_s25] sm:$0xff] %v810_v9 }
 0x401   : > { %1561 = shalt.err (!%p1558_p9)
}
 0x402   : > { %s1562_s19 = scalar_lea.hbm %s2118_s18, 128  ;;  %s1566_s9 = scalar_lea.hbm %s2173_s6, 256 }
 0x403   : > { %p1563_p7 = scmp.ne.s32.totalorder %s2118_s18, %s1562_s19  ;;  %p1567_p1 = scmp.lt.u32.totalorder %s2118_s18, %s2173_s6 }
 0x404   : > { %p1568_p4 = scmp.lt.u32.totalorder %s1566_s9, %s1562_s19  ;;  %p1570_p6 = scmp.lt.u32.totalorder %s1562_s19, %s2118_s18 }
 0x405   : > { %p1564_p3 = pnand %p1563_p7, %p1820_p8 }
 0x406   : > { %p1569_p2 = por %p1568_p4, %p1567_p1 }
 0x407   : > { %p1565_p11 = pneg %p1564_p3 }
 0x408   : > { %p1571_p12 = por %p1570_p6, %p1569_p2 }
 0x40a   : > { %p1572_p0 = pnand %p1571_p12, %p1565_p11 }
 0x40c   : > { %1575 = shalt.err (!%p1572_p0)
}
 0x40d   : > { %1334 = dma.vmem_to_hbm [thread:$0]  (%p1820_p8), %s2120_s24, 128, %s2118_s18, %s820_s10  }
 0x40e PF: > { %s865_s15 = sand.u32 1, %s1618_s26   ;;  %p2201_p5 = scmp.ne.s32.totalorder %s2182_s13, 0 }
 0x40f   : > { %p2202_p10 = scmp.ge.s32.totalorder %s1638_s8, 2  ;;  %s866_s22 = scalar_lea.sflag [#allocation5], %s865_s15 }
 0x411   : > { %p1350_p13 = pnand %p2202_p10, %p2201_p5 }
 0x413   : > { %1609 = dma.done.wait (!%p1350_p13), %s866_s22, 128  }
 0x414   : > { %1611 = vsyncadd (!%p1350_p13), %s866_s22, 4294967168  ;;  %s875_s14 = scalar_lea.sflag [#allocation11], %s865_s15 }
 0x415   : > { %1613 = dma.done.wait (!%p1350_p13), %s875_s14, 128  }
 0x416   : > { %1615 = vsyncadd (!%p1350_p13), %s875_s14, 4294967168  ;;  %s29_s8 = sadd.s32 1, %s1638_s8   ;;  %s2203_s26 = smov %s1622_s27 }
 0x417   : > { %p26_p9 = scmp.ge.s32.totalorder %s29_s8, 4   ;;  %s2204_s27 = smov %s1626_s28 }
 0x418   : > { %s2205_s28 = smov %s1829_s5  ;;  %s2206_s29 = smov %s1634_s30 }
 0x419   : > { %s2207_s30 = smov %s2209_s21  ;;  %28 = sbr.rel (!%p26_p9) target bundleno = 11 (0xb), region = 115 }
 0x420   :  { %880 = vsyncpa [#allocation4], 1 }
 0x421   :  { %882 = vsyncpa [#allocation4 + $0x1], 1 }
 0x422   :  { %883 = vsyncpa [#allocation7], 1 }
 0x423   :  { %884 = vsyncpa [#allocation5], 1 }
 0x424   :  { %886 = vsyncpa [#allocation5 + $0x1], 1 }
 0x425   :  { %887 = vsyncpa [#allocation11], 1 }
 0x426   :  { %889 = vsyncpa [#allocation11 + $0x1], 1 }

</bundles_post_ra>
